<compile_context>
chip_gen: v7x
topology: tpu7x:2x2x1
jax: 0.10.0
libtpu: 0.0.40
codegen_flags: <defaults>
</compile_context>

<pallas_src>
import jax
import jax.numpy as jnp
from jax.experimental import pallas as pl
from jax.experimental.pallas import tpu as pltpu

LANE = 128
SUBLANE = 8


def _round_up(x, m):
    return (x + m - 1) // m * m


# ----------------------------------------------------------------------------
# Pallas kernel: fused 2-layer MLP on one row-tile of the (augmented) batch.
#   out = (relu(bf16(x) @ W1_bf16 + b1) @ W2_pad + b2_pad) * 25
# Row 0 of the full (augmented) batch is the normalized unit input; its output
# row is used by the wrapper to recover norm_scale (|| . || / 250).
# ----------------------------------------------------------------------------
def _fused_mlp_kernel(x_ref, w1_ref, b1_ref, w2_ref, b2_ref, o_ref):
    x = x_ref[...].astype(jnp.bfloat16)                               # (TM, D)
    h = jnp.dot(x, w1_ref[...], preferred_element_type=jnp.float32)   # MXU bf16->f32
    h = jnp.maximum(h + b1_ref[...], 0.0)                             # bias + ReLU
    y = jnp.dot(h, w2_ref[...], preferred_element_type=jnp.float32)   # (TM, Cpad)
    o_ref[...] = (y + b2_ref[...]) * 25.0                             # lane-dense store


def fused_mlp_forward(x_aug, w1_bf16, b1, w2_pad, b2_pad, *, block_rows):
    """Run the fused MLP kernel over the row-padded augmented batch."""
    n_rows, d_in = x_aug.shape
    hidden = w1_bf16.shape[1]
    c_pad = w2_pad.shape[1]
    assert n_rows % block_rows == 0

    flops = 2 * n_rows * d_in * hidden + 2 * n_rows * hidden * c_pad
    bytes_accessed = (x_aug.size * 4 + w1_bf16.size * 2 + b1.size * 4
                      + w2_pad.size * 4 + b2_pad.size * 4 + n_rows * c_pad * 4)

    return pl.pallas_call(
        _fused_mlp_kernel,
        out_shape=jax.ShapeDtypeStruct((n_rows, c_pad), jnp.float32),
        grid_spec=pltpu.PrefetchScalarGridSpec(
            num_scalar_prefetch=0,
            grid=(n_rows // block_rows,),
            in_specs=[
                pl.BlockSpec((block_rows, d_in), lambda i: (i, 0)),   # x row-tile
                pl.BlockSpec(w1_bf16.shape, lambda i: (0, 0)),        # weights stay
                pl.BlockSpec(b1.shape, lambda i: (0, 0)),             # resident across
                pl.BlockSpec(w2_pad.shape, lambda i: (0, 0)),         # the grid
                pl.BlockSpec(b2_pad.shape, lambda i: (0, 0)),
            ],
            out_specs=pl.BlockSpec((block_rows, c_pad), lambda i: (i, 0)),
        ),
        compiler_params=pltpu.CompilerParams(
            dimension_semantics=("parallel",)),                       # v7x: 2 TCs
        cost_estimate=pl.CostEstimate(
            flops=int(flops), transcendentals=0,
            bytes_accessed=int(bytes_accessed)),
    )(x_aug, w1_bf16, b1, w2_pad, b2_pad)


# ----------------------------------------------------------------------------
# NormOutputNet wrapper (plain-JAX glue around the single Pallas hot path).
# ----------------------------------------------------------------------------
class NormOutputNet:
    def __init__(self, raw_params):
        d_in, hidden = raw_params["w1"].shape
        n_classes = raw_params["w2"].shape[1]
        c_pad = _round_up(n_classes, LANE)
        # One-time parameter prep (amortized over all forward calls):
        #  * W1 in bf16 halves the dominant per-call HBM->VMEM transfer.
        #  * W2/b2 zero-padded to 128 output lanes -> unmasked lane-dense stores;
        #    padded output columns are exactly zero and are sliced off.
        self.w1 = raw_params["w1"].astype(jnp.bfloat16)
        self.b1 = raw_params["b1"].astype(jnp.float32)
        self.w2 = jnp.zeros((hidden, c_pad), jnp.float32).at[:, :n_classes].set(
            raw_params["w2"].astype(jnp.float32))
        self.b2 = jnp.zeros((1, c_pad), jnp.float32).at[:, :n_classes].set(
            raw_params["b2"].astype(jnp.float32))
        self.d_in = d_in
        self.n_classes = n_classes
        self.norm_scale = None

    def forward(self, x_nchw):
        n = x_nchw.shape[0]
        x_flat = x_nchw.reshape(n, -1).astype(jnp.float32)
        d = x_flat.shape[1]

        # Row 0 = unit input (ones / ||ones|| = 1/sqrt(D)).  Its (unscaled) model
        # output norm is recovered from the kernel output, so the norm_scale
        # side effect and y = model(x)*25 share ONE pallas_call (one weight DMA).
        n_aug = n + 1
        block_rows = min(128, _round_up(n_aug, SUBLANE))
        n_pad = _round_up(n_aug, block_rows)
        x_aug = jnp.zeros((n_pad, d), jnp.float32)
        x_aug = x_aug.at[0, :].set(1.0 / (float(d) ** 0.5))
        x_aug = x_aug.at[1:n_aug, :].set(x_flat)

        out = fused_mlp_forward(x_aug, self.w1, self.b1, self.w2, self.b2,
                                block_rows=block_rows)

        if self.norm_scale is None:
            # out[0] = model(unit_input) * 25 with exactly-zero padded lanes,
            # so ||model(unit_input)|| / 10 == ||out[0]|| / 250.
            self.norm_scale = jnp.linalg.norm(out[0, :]) / 250.0
            # TODO(synk): the torch module also print()s ||model(x)|| and
            # norm_scale here; printing is a host-side side effect, skipped.

        return out[1:n_aug, : self.n_classes]


# ----------------------------------------------------------------------------
# Deterministic parameter init + pure-JAX reference mirroring kernel numerics
# (bf16 first matmul with f32 accumulation, f32 elsewhere).
# ----------------------------------------------------------------------------
def make_params(key, d_in, hidden, n_classes):
    k1, k2, k3, k4 = jax.random.split(key, 4)
    w1 = jax.random.normal(k1, (d_in, hidden), jnp.float32) * 0.05
    b1 = jax.random.normal(k2, (1, hidden), jnp.float32) * 0.05
    w2 = jax.random.normal(k3, (hidden, n_classes), jnp.float32) * 0.05
    b2 = jax.random.normal(k4, (1, n_classes), jnp.float32) * 0.05
    return {"w1": w1, "b1": b1, "w2": w2, "b2": b2}


def _ref_mlp(raw, x_flat):
    h = jnp.dot(x_flat.astype(jnp.bfloat16), raw["w1"].astype(jnp.bfloat16),
                preferred_element_type=jnp.float32)
    h = jnp.maximum(h + raw["b1"], 0.0)
    return jnp.dot(h, raw["w2"], preferred_element_type=jnp.float32) + raw["b2"]


def reference_forward(raw, x_nchw):
    n = x_nchw.shape[0]
    return _ref_mlp(raw, x_nchw.reshape(n, -1).astype(jnp.float32)) * 25.0


if __name__ == "__main__":
    key = jax.random.PRNGKey(0)
    k_x, k_p = jax.random.split(key)

    # Small NCHW input consistent with an image-classifier wrapped model.
    N, C, H, W = 2, 4, 16, 16
    D_IN = C * H * W          # 1024
    HIDDEN = 32
    N_CLASSES = 10

    x = jax.random.normal(k_x, (N, C, H, W), jnp.float32)
    raw_params = make_params(k_p, D_IN, HIDDEN, N_CLASSES)

    net = NormOutputNet(raw_params)
    y = jax.block_until_ready(net.forward(x))
    ns = jax.block_until_ready(net.norm_scale)

    # Correctness checks against a pure-JAX reference with matching numerics.
    y_ref = reference_forward(raw_params, x)
    unit = jnp.full((1, D_IN), 1.0 / (float(D_IN) ** 0.5), jnp.float32)
    ns_ref = jnp.linalg.norm(_ref_mlp(raw_params, unit)) / 10.0

    assert y.shape == (N, N_CLASSES)
    assert jnp.allclose(y, y_ref, atol=1e-3, rtol=1e-3), "output mismatch vs reference"
    assert jnp.allclose(ns, ns_ref, atol=1e-3, rtol=1e-2), "norm_scale mismatch vs reference"

    # Second call: norm_scale is already cached; still exactly one pallas_call.
    y2 = jax.block_until_ready(net.forward(x))
    assert jnp.allclose(y2, y_ref, atol=1e-3, rtol=1e-3), "second-call mismatch"

    print("KERNEL_OK")
</pallas_src>

<mosaic_0001>
module attributes {stable_mosaic.version = 11 : i64} {
  func.func @_fused_mlp_kernel(%arg0: i32, %arg1: memref<8x1024xf32, #tpu.memory_space<vmem>>, %arg2: memref<1024x32xbf16, #tpu.memory_space<vmem>>, %arg3: memref<1x32xf32, #tpu.memory_space<vmem>>, %arg4: memref<32x128xf32, #tpu.memory_space<vmem>>, %arg5: memref<1x128xf32, #tpu.memory_space<vmem>>, %arg6: memref<8x128xf32, #tpu.memory_space<vmem>>) attributes {dimension_semantics = [#tpu.dimension_semantics<parallel>], iteration_bounds = array<i64: 1>, scalar_prefetch = 0 : i64, scratch_operands = 0 : i64, tpu.core_type = #tpu.core_type<tc>, window_params = [{transform_indices = @transform_0, window_bounds = array<i64: 8, 1024>}, {pipeline_mode = #tpu.pipeline_mode<synchronous>, transform_indices = @transform_1, window_bounds = array<i64: 1024, 32>}, {pipeline_mode = #tpu.pipeline_mode<synchronous>, transform_indices = @transform_2, window_bounds = array<i64: 1, 32>}, {pipeline_mode = #tpu.pipeline_mode<synchronous>, transform_indices = @transform_3, window_bounds = array<i64: 32, 128>}, {pipeline_mode = #tpu.pipeline_mode<synchronous>, transform_indices = @transform_4, window_bounds = array<i64: 1, 128>}, {transform_indices = @transform_5, window_bounds = array<i64: 8, 128>}]} {
    %c0 = arith.constant 0 : index
    %c0_0 = arith.constant 0 : index
    %0 = vector.load %arg1[%c0, %c0_0] : memref<8x1024xf32, #tpu.memory_space<vmem>>, vector<8x1024xf32>
    %1 = arith.truncf %0 : vector<8x1024xf32> to vector<8x1024xbf16>
    %c0_1 = arith.constant 0 : index
    %c0_2 = arith.constant 0 : index
    %2 = vector.load %arg2[%c0_1, %c0_2] : memref<1024x32xbf16, #tpu.memory_space<vmem>>, vector<1024x32xbf16>
    %cst = arith.constant dense<0.000000e+00> : vector<8x32xf32>
    %3 = tpu.matmul %1, %2, %cst {dimension_numbers = #tpu.dot_dimension_numbers<[1], [0], [0], [1], [0, 0, 1, 1], [], []>} : vector<8x1024xbf16>, vector<1024x32xbf16>, vector<8x32xf32> -> vector<8x32xf32>
    %c0_3 = arith.constant 0 : index
    %c0_4 = arith.constant 0 : index
    %4 = vector.load %arg3[%c0_3, %c0_4] : memref<1x32xf32, #tpu.memory_space<vmem>>, vector<1x32xf32>
    %5 = vector.broadcast %4 : vector<1x32xf32> to vector<8x32xf32>
    %6 = arith.addf %3, %5 : vector<8x32xf32>
    %cst_5 = arith.constant 0.000000e+00 : f32
    %7 = vector.broadcast %cst_5 : f32 to vector<8x32xf32>
    %8 = arith.maximumf %6, %7 : vector<8x32xf32>
    %c0_6 = arith.constant 0 : index
    %c0_7 = arith.constant 0 : index
    %9 = vector.load %arg4[%c0_6, %c0_7] : memref<32x128xf32, #tpu.memory_space<vmem>>, vector<32x128xf32>
    %cst_8 = arith.constant dense<0.000000e+00> : vector<8x128xf32>
    %10 = tpu.matmul %8, %9, %cst_8 {dimension_numbers = #tpu.dot_dimension_numbers<[1], [0], [0], [1], [0, 0, 1, 1], [], []>} : vector<8x32xf32>, vector<32x128xf32>, vector<8x128xf32> -> vector<8x128xf32>
    %c0_9 = arith.constant 0 : index
    %c0_10 = arith.constant 0 : index
    %11 = vector.load %arg5[%c0_9, %c0_10] : memref<1x128xf32, #tpu.memory_space<vmem>>, vector<1x128xf32>
    %12 = vector.broadcast %11 : vector<1x128xf32> to vector<8x128xf32>
    %13 = arith.addf %10, %12 : vector<8x128xf32>
    %cst_11 = arith.constant 2.500000e+01 : f32
    %14 = vector.broadcast %cst_11 : f32 to vector<8x128xf32>
    %15 = arith.mulf %13, %14 : vector<8x128xf32>
    %c0_12 = arith.constant 0 : index
    %c0_13 = arith.constant 0 : index
    %16 = vector.load %arg6[%c0_12, %c0_13] : memref<8x128xf32, #tpu.memory_space<vmem>>, vector<8x128xf32>
    tpu.vector_store %arg6[%c0_12, %c0_13], %15 {strides = array<i32>} : memref<8x128xf32, #tpu.memory_space<vmem>>, vector<8x128xf32>,
    return
  }
  func.func @transform_0(%arg0: i32) -> (i32, i32) {
    %c0_i32 = arith.constant 0 : i32
    %c0_i32_0 = arith.constant 0 : i32
    return %arg0, %c0_i32 : i32, i32
  }
  func.func @transform_1(%arg0: i32) -> (i32, i32) {
    %c0_i32 = arith.constant 0 : i32
    %c0_i32_0 = arith.constant 0 : i32
    %c0_i32_1 = arith.constant 0 : i32
    return %c0_i32, %c0_i32_0 : i32, i32
  }
  func.func @transform_2(%arg0: i32) -> (i32, i32) {
    %c0_i32 = arith.constant 0 : i32
    %c0_i32_0 = arith.constant 0 : i32
    %c0_i32_1 = arith.constant 0 : i32
    return %c0_i32, %c0_i32_0 : i32, i32
  }
  func.func @transform_3(%arg0: i32) -> (i32, i32) {
    %c0_i32 = arith.constant 0 : i32
    %c0_i32_0 = arith.constant 0 : i32
    %c0_i32_1 = arith.constant 0 : i32
    return %c0_i32, %c0_i32_0 : i32, i32
  }
  func.func @transform_4(%arg0: i32) -> (i32, i32) {
    %c0_i32 = arith.constant 0 : i32
    %c0_i32_0 = arith.constant 0 : i32
    %c0_i32_1 = arith.constant 0 : i32
    return %c0_i32, %c0_i32_0 : i32, i32
  }
  func.func @transform_5(%arg0: i32) -> (i32, i32) {
    %c0_i32 = arith.constant 0 : i32
    %c0_i32_0 = arith.constant 0 : i32
    return %arg0, %c0_i32 : i32, i32
  }
}

</mosaic_0001>

<bundles_post_ra>
// kernel: tpu_custom_call.1
= control target key start
LH: loop header
LB: loop body
LE: loop exit
PB: predicated region body
PF: predicated region fallthrough
CT: control target
= control target key end

     0   :  { %s1368_s0 = inlined_call_operand.vmem [shape: f32[8,1024], index: 0, kind: input, shape index: {}]   ;;  %s1369_s1 = inlined_call_operand.vmem [shape: bf16[1024,32], index: 1, kind: input, shape index: {}]   ;;  %s1370_s2 = inlined_call_operand.vmem [shape: f32[1,32], index: 2, kind: input, shape index: {}]   ;;  %s1371_s3 = inlined_call_operand.vmem [shape: f32[32,128], index: 3, kind: input, shape index: {}]   ;;  %s1372_s4 = inlined_call_operand.vmem [shape: f32[1,128], index: 4, kind: input, shape index: {}]   ;;  %s1373_s5 = inlined_call_operand.hbm [shape: f32[8,128], index: 5, kind: output, shape index: {}]  }
   0x1   :  { %v1000_v0 = vld [vmem:[%s1369_s1 + $0x40] sm:$0xff]   ;;  %v1004_v4 = vld [vmem:[%s1369_s1 + $0x48] sm:$0xff]   ;;  %v1008_v8 = vld [vmem:[%s1369_s1 + $0x50] sm:$0xff]  }
   0x2   :  { %v1001_v1 = vld [vmem:[%s1369_s1 + $0xc0] sm:$0xff]   ;;  %886 = vmatprep.subr.bf16.mxu0 %v1000_v0  ;;  %v1005_v5 = vld [vmem:[%s1369_s1 + $0xc8] sm:$0xff]   ;;  %v1009_v9 = vld [vmem:[%s1369_s1 + $0xd0] sm:$0xff]  }
   0x3   :  { %v1002_v2 = vld [vmem:[%s1369_s1] sm:$0xff]   ;;  %908 = vmatprep.subr.bf16.mxu1 %v1001_v1  ;;  %v1006_v6 = vld [vmem:[%s1369_s1 + $0x8] sm:$0xff]   ;;  %v1010_v10 = vld [vmem:[%s1369_s1 + $0x10] sm:$0xff]  }
   0x4   :  { %v1003_v3 = vld [vmem:[%s1369_s1 + $0x80] sm:$0xff]   ;;  %887 = vmatpush3.bf16.msra.mxu0 %v1002_v2  ;;  %v1007_v7 = vld [vmem:[%s1369_s1 + $0x88] sm:$0xff]   ;;  %v1011_v11 = vld [vmem:[%s1369_s1 + $0x90] sm:$0xff]  }
   0x5   :  { %909 = vmatpush3.bf16.msra.mxu1 %v1003_v3  ;;  %888 = vmatprep.subr.bf16.mxu0 %v1004_v4  ;;  %v1012_v12 = vld [vmem:[%s1369_s1 + $0x58] sm:$0xff]   ;;  %v1016_v16 = vld [vmem:[%s1369_s1 + $0x60] sm:$0xff]   ;;  %v1020_v20 = vld [vmem:[%s1369_s1 + $0x68] sm:$0xff]  }
   0x6   :  { %910 = vmatprep.subr.bf16.mxu1 %v1005_v5  ;;  %v1013_v13 = vld [vmem:[%s1369_s1 + $0xd8] sm:$0xff]   ;;  %v1017_v17 = vld [vmem:[%s1369_s1 + $0xe0] sm:$0xff]   ;;  %v1021_v21 = vld [vmem:[%s1369_s1 + $0xe8] sm:$0xff]  }
   0x7   :  { %v1014_v14 = vld [vmem:[%s1369_s1 + $0x18] sm:$0xff]   ;;  %v1018_v18 = vld [vmem:[%s1369_s1 + $0x20] sm:$0xff]   ;;  %v1022_v22 = vld [vmem:[%s1369_s1 + $0x28] sm:$0xff]  }
   0x8   :  { %889 = vmatpush3.bf16.msra.mxu0 %v1006_v6  ;;  %v1015_v15 = vld [vmem:[%s1369_s1 + $0x98] sm:$0xff]   ;;  %v1019_v19 = vld [vmem:[%s1369_s1 + $0xa0] sm:$0xff]   ;;  %v1023_v23 = vld [vmem:[%s1369_s1 + $0xa8] sm:$0xff]  }
   0x9   :  { %911 = vmatpush3.bf16.msra.mxu1 %v1007_v7  ;;  %890 = vmatprep.subr.bf16.mxu0 %v1008_v8  ;;  %v1024_v24 = vld [vmem:[%s1369_s1 + $0x70] sm:$0xff]   ;;  %v1028_v28 = vld [vmem:[%s1369_s1 + $0x78] sm:$0xff]   ;;  %v23_v32 = vld [vmem:[%s1368_s0 + $0x8] sm:$0xff] }
   0xa   :  { %912 = vmatprep.subr.bf16.mxu1 %v1009_v9  ;;  %v1025_v25 = vld [vmem:[%s1369_s1 + $0xf0] sm:$0xff]   ;;  %v1029_v29 = vld [vmem:[%s1369_s1 + $0xf8] sm:$0xff]   ;;  %v22_v34 = vld [vmem:[%s1368_s0] sm:$0xff]  ;;  %v31_v35 = vpack.c.bf16 %v23_v32, %v23_v32 }
   0xb   :  { %v1026_v26 = vld [vmem:[%s1369_s1 + $0x30] sm:$0xff]   ;;  %v1030_v30 = vld [vmem:[%s1369_s1 + $0x38] sm:$0xff]   ;;  %v30_v37 = vpack.c.bf16 %v22_v34, %v22_v34  ;;  %v1032_v40 = vld [vmem:[%s1369_s1 + $0x140] sm:$0xff]  }
   0xc   :  { %891 = vmatpush3.bf16.msra.mxu0 %v1010_v10  ;;  %v1027_v27 = vld [vmem:[%s1369_s1 + $0xb0] sm:$0xff]   ;;  %v1031_v31 = vld [vmem:[%s1369_s1 + $0xb8] sm:$0xff]   ;;  %589 = vmatprep.mubr.bf16.mxu0 %v31_v35  ;;  %v1033_v41 = vld [vmem:[%s1369_s1 + $0x1c0] sm:$0xff]  }
   0xd   :  { %913 = vmatpush3.bf16.msra.mxu1 %v1011_v11  ;;  %892 = vmatprep.subr.bf16.mxu0 %v1012_v12  ;;  %v25_v33 = vld [vmem:[%s1368_s0 + $0x18] sm:$0xff]  ;;  %v24_v38 = vld [vmem:[%s1368_s0 + $0x10] sm:$0xff]  ;;  %v1034_v42 = vld [vmem:[%s1369_s1 + $0x100] sm:$0xff]  }
   0xe   :  { %914 = vmatprep.subr.bf16.mxu1 %v1013_v13  ;;  %v33_v36 = vpack.c.bf16 %v25_v33, %v25_v33  ;;  %v32_v39 = vpack.c.bf16 %v24_v38, %v24_v38  ;;  %v1035_v43 = vld [vmem:[%s1369_s1 + $0x180] sm:$0xff]   ;;  %v1036_v44 = vld [vmem:[%s1369_s1 + $0x148] sm:$0xff]   ;;  %v1040_v48 = vld [vmem:[%s1369_s1 + $0x150] sm:$0xff]  }
   0xf   :  { %v1037_v45 = vld [vmem:[%s1369_s1 + $0x1c8] sm:$0xff]   ;;  %v1041_v49 = vld [vmem:[%s1369_s1 + $0x1d0] sm:$0xff]   ;;  %v1044_v52 = vld [vmem:[%s1369_s1 + $0x158] sm:$0xff]  }
  0x10   :  { %893 = vmatpush3.bf16.msra.mxu0 %v1014_v14  ;;  %629 = vmatprep.mubr.bf16.mxu1 %v33_v36  ;;  %v1038_v46 = vld [vmem:[%s1369_s1 + $0x108] sm:$0xff]   ;;  %v1042_v50 = vld [vmem:[%s1369_s1 + $0x110] sm:$0xff]   ;;  %v1045_v53 = vld [vmem:[%s1369_s1 + $0x1d8] sm:$0xff]  }
  0x11   :  { %915 = vmatpush3.bf16.msra.mxu1 %v1015_v15  ;;  %894 = vmatprep.subr.bf16.mxu0 %v1016_v16  ;;  %v1039_v47 = vld [vmem:[%s1369_s1 + $0x188] sm:$0xff]   ;;  %v1043_v51 = vld [vmem:[%s1369_s1 + $0x190] sm:$0xff]   ;;  %v1046_v54 = vld [vmem:[%s1369_s1 + $0x118] sm:$0xff]  }
  0x12   :  { %916 = vmatprep.subr.bf16.mxu1 %v1017_v17  ;;  %v1047_v55 = vld [vmem:[%s1369_s1 + $0x198] sm:$0xff]   ;;  %v1048_v56 = vld [vmem:[%s1369_s1 + $0x160] sm:$0xff]   ;;  %v1052_v60 = vld [vmem:[%s1369_s1 + $0x168] sm:$0xff]  }
  0x13   :  { %v1049_v57 = vld [vmem:[%s1369_s1 + $0x1e0] sm:$0xff]   ;;  %v1053_v61 = vld [vmem:[%s1369_s1 + $0x1e8] sm:$0xff]   ;;  %v1056_v0 = vld [vmem:[%s1369_s1 + $0x170] sm:$0xff]  }
  0x14   :  { %895 = vmatpush3.bf16.msra.mxu0 %v1018_v18  ;;  %v1050_v58 = vld [vmem:[%s1369_s1 + $0x120] sm:$0xff]   ;;  %v1054_v62 = vld [vmem:[%s1369_s1 + $0x128] sm:$0xff]   ;;  %v1057_v1 = vld [vmem:[%s1369_s1 + $0x1f0] sm:$0xff]  }
  0x15   :  { %917 = vmatpush3.bf16.msra.mxu1 %v1019_v19  ;;  %896 = vmatprep.subr.bf16.mxu0 %v1020_v20  ;;  %v1051_v59 = vld [vmem:[%s1369_s1 + $0x1a0] sm:$0xff]   ;;  %v1055_v63 = vld [vmem:[%s1369_s1 + $0x1a8] sm:$0xff]   ;;  %v1058_v2 = vld [vmem:[%s1369_s1 + $0x130] sm:$0xff]  }
  0x16   :  { %918 = vmatprep.subr.bf16.mxu1 %v1021_v21  ;;  %v1059_v3 = vld [vmem:[%s1369_s1 + $0x1b0] sm:$0xff]   ;;  %v1060_v4 = vld [vmem:[%s1369_s1 + $0x178] sm:$0xff]   ;;  %v27_v8 = vld [vmem:[%s1368_s0 + $0x28] sm:$0xff] }
  0x17   :  { %v1061_v5 = vld [vmem:[%s1369_s1 + $0x1f8] sm:$0xff]   ;;  %v35_v10 = vpack.c.bf16 %v27_v8, %v27_v8  ;;  %v26_v12 = vld [vmem:[%s1368_s0 + $0x20] sm:$0xff]  ;;  %v28_v13 = vld [vmem:[%s1368_s0 + $0x30] sm:$0xff] }
  0x18   :  { %897 = vmatpush3.bf16.msra.mxu0 %v1022_v22  ;;  %v1062_v6 = vld [vmem:[%s1369_s1 + $0x138] sm:$0xff]  }
  0x19   :  { %919 = vmatpush3.bf16.msra.mxu1 %v1023_v23  ;;  %898 = vmatprep.subr.bf16.mxu0 %v1024_v24  ;;  %v1063_v7 = vld [vmem:[%s1369_s1 + $0x1b8] sm:$0xff]  }
  0x1a   :  { %920 = vmatprep.subr.bf16.mxu1 %v1025_v25  ;;  %v29_v9 = vld [vmem:[%s1368_s0 + $0x38] sm:$0xff] }
  0x1b   :  { %v37_v11 = vpack.c.bf16 %v29_v9, %v29_v9 }
  0x1c   :  { %899 = vmatpush3.bf16.msra.mxu0 %v1026_v26 }
  0x1d   :  { %921 = vmatpush3.bf16.msra.mxu1 %v1027_v27  ;;  %900 = vmatprep.subr.bf16.mxu0 %v1028_v28 }
  0x1e   :  { %922 = vmatprep.subr.bf16.mxu1 %v1029_v29 }
  0x20   :  { %901 = vmatpush3.bf16.msra.mxu0 %v1030_v30 }
  0x21   :  { %923 = vmatpush3.bf16.msra.mxu1 %v1031_v31  ;;  %930 = vmatprep.subr.bf16.mxu0 %v1032_v40 }
  0x22   :  { %952 = vmatprep.subr.bf16.mxu1 %v1033_v41 }
  0x23   :  { %590 = vmatmul.mubr.bf16.vlgmr.msra.gmra.mrb[0].mxu0 %v30_v37 }
  0x24   :  { %630 = vmatmul.mubr.bf16.vlgmr.msra.gmra.mrb[0].mxu1 %v32_v39  ;;  %931 = vmatpush3.bf16.msra.mxu0 %v1034_v42 }
  0x25   :  { %953 = vmatpush3.bf16.msra.mxu1 %v1035_v43  ;;  %932 = vmatprep.subr.bf16.mxu0 %v1036_v44 }
  0x26   :  { %954 = vmatprep.subr.bf16.mxu1 %v1037_v45 }
  0x28   :  { %933 = vmatpush3.bf16.msra.mxu0 %v1038_v46 }
  0x29   :  { %955 = vmatpush3.bf16.msra.mxu1 %v1039_v47  ;;  %934 = vmatprep.subr.bf16.mxu0 %v1040_v48 }
  0x2a   :  { %956 = vmatprep.subr.bf16.mxu1 %v1041_v49 }
  0x2c   :  { %935 = vmatpush3.bf16.msra.mxu0 %v1042_v50 }
  0x2d   :  { %957 = vmatpush3.bf16.msra.mxu1 %v1043_v51  ;;  %936 = vmatprep.subr.bf16.mxu0 %v1044_v52 }
  0x2e   :  { %958 = vmatprep.subr.bf16.mxu1 %v1045_v53 }
  0x30   :  { %937 = vmatpush3.bf16.msra.mxu0 %v1046_v54 }
  0x31   :  { %959 = vmatpush3.bf16.msra.mxu1 %v1047_v55  ;;  %938 = vmatprep.subr.bf16.mxu0 %v1048_v56 }
  0x32   :  { %960 = vmatprep.subr.bf16.mxu1 %v1049_v57 }
  0x34   :  { %939 = vmatpush3.bf16.msra.mxu0 %v1050_v58 }
  0x35   :  { %961 = vmatpush3.bf16.msra.mxu1 %v1051_v59  ;;  %940 = vmatprep.subr.bf16.mxu0 %v1052_v60 }
  0x36   :  { %962 = vmatprep.subr.bf16.mxu1 %v1053_v61 }
  0x38   :  { %941 = vmatpush3.bf16.msra.mxu0 %v1054_v62 }
  0x39   :  { %963 = vmatpush3.bf16.msra.mxu1 %v1055_v63  ;;  %942 = vmatprep.subr.bf16.mxu0 %v1056_v0 }
  0x3a   :  { %964 = vmatprep.subr.bf16.mxu1 %v1057_v1 }
  0x3c   :  { %943 = vmatpush3.bf16.msra.mxu0 %v1058_v2 }
  0x3d   :  { %965 = vmatpush3.bf16.msra.mxu1 %v1059_v3  ;;  %944 = vmatprep.subr.bf16.mxu0 %v1060_v4 }
  0x3e   :  { %966 = vmatprep.subr.bf16.mxu1 %v1061_v5 }
  0x40   :  { %945 = vmatpush3.bf16.msra.mxu0 %v1062_v6 }
  0x41   :  { %10 = vsyncpa [#allocation3], 0  ;;  %967 = vmatpush3.bf16.msra.mxu1 %v1063_v7  ;;  %v34_v14 = vpack.c.bf16 %v26_v12, %v26_v12  ;;  %v36_v15 = vpack.c.bf16 %v28_v13, %v28_v13  ;;  %669 = vmatprep.mubr.bf16.mxu0 %v35_v10  ;;  %v718_v16 = vld [vmem:[%s1371_s3] sm:$0xff]  ;;  %v719_v17 = vld [vmem:[%s1371_s3 + $0x8] sm:$0xff]  ;;  %v1088_v19 = vmov 0.0|0.0   ;;  %vm1089_vm0 = vmmov 0  }
  0x42   :  { %709 = vmatprep.mubr.bf16.mxu1 %v37_v11  ;;  %v991_v18 = vpack.c.bf16 %v719_v17, %v718_v16  ;;  %990 = vmatprep.subr.bf16.mxu0 %v1088_v19  ;;  %v720_v20 = vld [vmem:[%s1371_s3 + $0x10] sm:$0xff]  ;;  %v721_v21 = vld [vmem:[%s1371_s3 + $0x18] sm:$0xff]  ;;  %v1090_v23 = vmov 0.0   ;;  %v819_v26 = vld [vmem:[%s1370_s2] ss:$0 sm:$0xff]  ;;  %vm729_vm1 = vcmask 261120  }
  0x43   :  { %670 = vmatmul.mubr.bf16.vlgmr.msra.gmra.mrb[4].mxu0 %v34_v14  ;;  %v994_v22 = vpack.c.bf16 %v721_v21, %v720_v20  ;;  %v884_v50 = vld [vmem:[%s1372_s4] ss:$0 sm:$0xff]  ;;  %s1091_s20 = smov [#allocation2]  }
  0x44   :  { %710 = vmatmul.mubr.bf16.vlgmr.msra.gmra.mrb[4].mxu1 %v36_v15  ;;  %992 = vmatpush3.bf16.msra.mxu0 %v991_v18  ;;  %s811_s21 = sshll.u32 %s1091_s20, 4  ;;  %s812_s21 = int_to_ptr.vmem [resolvable:$true] %s811_s21 }
  0x45   :  { %993 = vmatprep.subr.bf16.mxu0 %v1088_v19  ;;  %987 = vmatprep.mubr.msk.f32.mxu0 %vm1089_vm0, %v1090_v23  ;;  %s1064_s22 = scalar_lea.vmem %s812_s21, 128  ;;  %p1069_p1 = scmp.lt.s32.totalorder %s812_s21, %s812_s21 }
  0x46   :  { %p1065_p0 = scmp.ne.s32.totalorder %s812_s21, %s1064_s22  ;;  %p1070_p2 = scmp.lt.s32.totalorder %s1064_s22, %s1064_s22 }
  0x48   :  { %995 = vmatpush3.bf16.msra.mxu0 %v994_v22  ;;  %p1071_p3 = por %p1070_p2, %p1069_p1 }
  0x4a   :  { %p1072_p4 = pnand %p1071_p3, %p1065_p0 }
  0xf6   :  { %v902_v24 = vpop.f32.mrb[0].mxu0 }
  0xf7   :  { %v924_v25 = vpop.f32.mrb[0].mxu1  ;;  %v903_v27 = vpop.f32.mrb[1].mxu0 }
  0xf8   :  { %v925_v28 = vpop.f32.mrb[1].mxu1  ;;  %v904_v29 = vadd.f32 %v903_v27, %v902_v24  ;;  %v905_v31 = vpop.f32.mrb[2].mxu0 }
  0xf9   :  { %v926_v30 = vadd.f32 %v925_v28, %v924_v25  ;;  %v927_v32 = vpop.f32.mrb[2].mxu1  ;;  %v906_v33 = vpop.f32.mrb[3].mxu0 }
  0xfa   :  { %v928_v34 = vpop.f32.mrb[3].mxu1  ;;  %v592_v35 = vadd.f32 %v904_v29, %v819_v26 }
  0xfc   :  { %v632_v36 = vadd.f32 %v926_v30, %v592_v35 }
 0x116   :  { %v946_v37 = vpop.f32.mrb[4].mxu0 }
 0x117   :  { %v968_v38 = vpop.f32.mrb[4].mxu1  ;;  %v947_v39 = vpop.f32.mrb[5].mxu0 }
 0x118   :  { %v948_v40 = vadd.f32 %v947_v39, %v946_v37  ;;  %v969_v41 = vpop.f32.mrb[5].mxu1  ;;  %v949_v42 = vpop.f32.mrb[6].mxu0 }
 0x119   :  { %v970_v43 = vadd.f32 %v969_v41, %v968_v38  ;;  %v971_v44 = vpop.f32.mrb[6].mxu1  ;;  %v950_v45 = vpop.f32.mrb[7].mxu0 }
 0x11a   :  { %v672_v46 = vadd.f32 %v948_v40, %v632_v36  ;;  %v972_v47 = vpop.f32.mrb[7].mxu1 }
 0x11c   :  { %v712_v48 = vadd.f32 %v970_v43, %v672_v46 }
 0x11e   :  { %v717_v49 = vmax.f32 %v712_v48, 0.0 }
 0x120   :  { %988 = vmatmul.mubr.msk.f32.vlgmr.msra.gmra.mrb[8].mxu0 %vm729_vm1, %v717_v49 }
 0x1f3   :  { %v799_v51 = vpop.f32.mrb[8].mxu0 }
 0x1f4   :  { %v800_v52 = vadd.f32 %v884_v50, %v799_v51  ;;  %v989_v53 = vpop.f32.mrb[9].mxu0 }
 0x1f6   :  { %v803_v54 = vmul.f32 25.0, %v800_v52 }
 0x1f8   :  { %804 = vst [vmem:[#allocation2] sm:$0xff] %v803_v54 }
 0x1f9   :  { %1075 = shalt.err (!%p1072_p4)
}
 0x1fa   :  { %s1076_s25 = scalar_lea.hbm %s1373_s5, 128 }
 0x1fb   :  { %p1077_p5 = scmp.ne.s32.totalorder %s1373_s5, %s1076_s25  ;;  %p1080_p6 = scmp.lt.u32.totalorder %s1076_s25, %s1373_s5 }
 0x1fd   :  { %p1082_p7 = pnand %p1080_p6, %p1077_p5 }
 0x1ff   :  { %1085 = shalt.err (!%p1082_p7)
}
 0x200   :  { %814 = dma.vmem_to_hbm [thread:$0]  %s812_s21, 128, %s1373_s5, [#allocation3]  }
 0x201   :  { %1086 = dma.done.wait [#allocation3], 128  }
 0x202   :  { %1087 = vsyncadd [#allocation3], 4294967168 }
 0x203   :  { %818 = vsyncpa [#allocation3], 1 }

</bundles_post_ra>
